<compile_context>
chip_gen: v5e
topology: v5e:2x2
jax: 0.10.0
libtpu: 0.0.40
codegen_flags: <defaults>
</compile_context>

<pallas_src>
import functools

import jax
import jax.numpy as jnp
from jax.experimental import pallas as pl
from jax.experimental.pallas import tpu as pltpu


def _round_up(a, b):
    return -(-a // b) * b


def _round_down(a, b):
    return (a // b) * b


def _cdiv(a, b):
    return -(-a // b)


def _balanced_tm(m, tm, pack):
    """Nudge tm so the m-grid extent is even (balances v7x's 2 TensorCores)."""
    grid_m = _cdiv(m, tm)
    if grid_m > 1 and grid_m % 2 == 1:
        tm2 = _round_up(_cdiv(m, grid_m + 1), pack)
        if pack <= tm2 < tm:
            tm = tm2
            grid_m = _cdiv(m, tm)
    return tm, grid_m


def _gap_kernel_single(x_ref, o_ref, *, inv_count):
    """Single k-tile (tk == K): one pass, no scratch, write the mean directly."""
    x = x_ref[...].astype(jnp.float32)
    s = jnp.sum(x, axis=1, keepdims=True)
    o_ref[...] = (s * inv_count).astype(o_ref.dtype)


def _gap_kernel_tiled(x_ref, o_ref, acc_ref, *, inv_count, k_size, tk):
    """Multi k-tile: lane-dense f32 accumulator, finalize on the last k step."""
    k = pl.program_id(1)

    @pl.when(k == 0)
    def _():
        acc_ref[...] = jnp.zeros_like(acc_ref)

    x = x_ref[...].astype(jnp.float32)

    # Ragged last k-tile: zero out-of-bounds lanes (mandatory since we no
    # longer pad).  Only emitted when K is not a multiple of tk.
    if k_size % tk != 0:
        rem = k_size - k * tk  # >= tk for all but the last tile -> all-true
        lane = jax.lax.broadcasted_iota(jnp.int32, x.shape, 1)
        x = jnp.where(lane < rem, x, 0.0)

    # Pure VPU adds over static 128-lane slices; no cross-lane (XLU) work in
    # the hot loop.
    partial = x[:, 0:128]
    for c in range(1, tk // 128):
        partial = partial + x[:, c * 128:(c + 1) * 128]
    acc_ref[...] += partial

    @pl.when(k == pl.num_programs(1) - 1)
    def _():
        s = jnp.sum(acc_ref[...], axis=1, keepdims=True)
        o_ref[...] = (s * inv_count).astype(o_ref.dtype)


def global_avg_pool2d(x, *, target_block_bytes=4 * 1024 * 1024):
    """Pallas TPU global average pool.  x: (N, C, H, W) -> (N, C)."""
    N, C, H, W = x.shape
    M, K = N * C, H * W
    x2 = x.reshape(M, K)  # NCHW is contiguous: free reshape, no extra HBM pass

    itemsize = jnp.dtype(x.dtype).itemsize
    pack = max(8, 32 // itemsize)  # sublane packing: 8 (f32), 16 (bf16), 32 (i8)
    inv_count = 1.0 / float(K)

    cost = pl.CostEstimate(
        flops=M * K,
        transcendentals=0,
        bytes_accessed=M * K * itemsize + M * itemsize,
    )

    if K * itemsize * pack <= target_block_bytes:
        # ---- Small-K path (ResNeSt: K = 49): tk = K, huge tm, single k step.
        tm = max(pack, _round_down(target_block_bytes // (K * itemsize), pack))
        tm = min(tm, _round_up(M, pack))
        tm, grid_m = _balanced_tm(M, tm, pack)

        out = pl.pallas_call(
            functools.partial(_gap_kernel_single, inv_count=inv_count),
            out_shape=jax.ShapeDtypeStruct((M, 1), x.dtype),
            grid=(grid_m,),
            in_specs=[pl.BlockSpec((tm, K), lambda i: (i, 0))],
            out_specs=pl.BlockSpec((tm, 1), lambda i: (i, 0)),
            compiler_params=pltpu.CompilerParams(
                dimension_semantics=("parallel",)),
            cost_estimate=cost,
        )(x2)
    else:
        # ---- Large-K path: tile the reduction axis, accumulate in VMEM.
        tm = min(pack * 64, _round_up(M, pack))   # ~512 rows for f32
        tm, grid_m = _balanced_tm(M, tm, pack)
        tk = max(128, _round_down(target_block_bytes // (tm * itemsize), 128))
        grid_k = _cdiv(K, tk)

        out = pl.pallas_call(
            functools.partial(_gap_kernel_tiled, inv_count=inv_count,
                              k_size=K, tk=tk),
            out_shape=jax.ShapeDtypeStruct((M, 1), x.dtype),
            grid=(grid_m, grid_k),
            in_specs=[pl.BlockSpec((tm, tk), lambda i, k: (i, k))],
            out_specs=pl.BlockSpec((tm, 1), lambda i, k: (i, 0)),
            scratch_shapes=[pltpu.VMEM((tm, 128), jnp.float32)],
            compiler_params=pltpu.CompilerParams(
                dimension_semantics=("parallel", "arbitrary")),
            cost_estimate=cost,
        )(x2)

    return out.reshape(N, C)


if __name__ == "__main__":
    key = jax.random.PRNGKey(0)

    # Required small test shape.
    N, C, H, W = 2, 4, 16, 16
    x = jax.random.normal(key, (N, C, H, W), dtype=jnp.float32)
    out = jax.block_until_ready(jax.jit(global_avg_pool2d)(x))
    ref = jnp.mean(x, axis=(2, 3))
    assert out.shape == (N, C), out.shape
    assert jnp.allclose(out, ref, rtol=1e-5, atol=1e-5), float(
        jnp.max(jnp.abs(out - ref)))

    # Ragged-M + ResNeSt-style 7x7 spatial (small-K path, partial row block).
    k2 = jax.random.PRNGKey(1)
    x2 = jax.random.normal(k2, (3, 5, 7, 7), dtype=jnp.float32)
    out2 = jax.block_until_ready(jax.jit(global_avg_pool2d)(x2))
    ref2 = jnp.mean(x2, axis=(2, 3))
    assert jnp.allclose(out2, ref2, rtol=1e-5, atol=1e-5), float(
        jnp.max(jnp.abs(out2 - ref2)))

    # Force the tiled (large-K) path with a tiny VMEM target: exercises the
    # accumulator and the ragged-last-K lane mask.
    k3 = jax.random.PRNGKey(2)
    x3 = jax.random.normal(k3, (2, 3, 33, 65), dtype=jnp.float32)  # K = 2145
    f3 = jax.jit(functools.partial(global_avg_pool2d,
                                   target_block_bytes=32 * 1024))
    out3 = jax.block_until_ready(f3(x3))
    ref3 = jnp.mean(x3, axis=(2, 3))
    assert jnp.allclose(out3, ref3, rtol=1e-5, atol=1e-5), float(
        jnp.max(jnp.abs(out3 - ref3)))

    print("KERNEL_OK")
</pallas_src>

<mosaic_0001>
module attributes {stable_mosaic.version = 11 : i64} {
  func.func @_gap_kernel_single(%arg0: i32, %arg1: memref<8x256xf32, #tpu.memory_space<vmem>>, %arg2: memref<8x1xf32, #tpu.memory_space<vmem>>) attributes {dimension_semantics = [#tpu.dimension_semantics<parallel>], iteration_bounds = array<i64: 1>, scalar_prefetch = 0 : i64, scratch_operands = 0 : i64, tpu.core_type = #tpu.core_type<tc>, window_params = [{transform_indices = @transform_0, window_bounds = array<i64: 8, 256>}, {transform_indices = @transform_1, window_bounds = array<i64: 8, 1>}]} {
    %c0 = arith.constant 0 : index
    %c0_0 = arith.constant 0 : index
    %0 = vector.load %arg1[%c0, %c0_0] : memref<8x256xf32, #tpu.memory_space<vmem>>, vector<8x256xf32>
    %cst = arith.constant dense<0.000000e+00> : vector<8xf32>
    %1 = vector.multi_reduction <add>, %0, %cst [1] : vector<8x256xf32> to vector<8xf32>
    %2 = vector.shape_cast %1 : vector<8xf32> to vector<8x1xf32>
    %cst_1 = arith.constant 3.906250e-03 : f32
    %3 = vector.broadcast %cst_1 : f32 to vector<8x1xf32>
    %4 = arith.mulf %2, %3 : vector<8x1xf32>
    %c0_2 = arith.constant 0 : index
    %c0_3 = arith.constant 0 : index
    %5 = vector.load %arg2[%c0_2, %c0_3] : memref<8x1xf32, #tpu.memory_space<vmem>>, vector<8x1xf32>
    tpu.vector_store %arg2[%c0_2, %c0_3], %4 {strides = array<i32>} : memref<8x1xf32, #tpu.memory_space<vmem>>, vector<8x1xf32>,
    return
  }
  func.func @transform_0(%arg0: i32) -> (i32, i32) {
    %c0_i32 = arith.constant 0 : i32
    %c0_i32_0 = arith.constant 0 : i32
    return %arg0, %c0_i32 : i32, i32
  }
  func.func @transform_1(%arg0: i32) -> (i32, i32) {
    %c0_i32 = arith.constant 0 : i32
    %c0_i32_0 = arith.constant 0 : i32
    return %arg0, %c0_i32 : i32, i32
  }
}

</mosaic_0001>

<bundles_post_ra>
// kernel: global_avg_pool2d.1
= control target key start
LH: loop header
LB: loop body
LE: loop exit
PB: predicated region body
PF: predicated region fallthrough
CT: control target
= control target key end

     0   :  { %vm14_vm0 = vcmask 7168   ;;  %s39_s0 = inlined_call_operand.vmem [shape: f32[8,256], index: 0, kind: input, shape index: {}]   ;;  %s40_s1 = inlined_call_operand.vmem [shape: f32[8,1], index: 1, kind: output, shape index: {}]  }
   0x1   :  { %v8_v0 = vld [vmem:[%s39_s0] sm:$0xff]  ;;  %v9_v1 = vld [vmem:[%s39_s0 + $0x8] sm:$0xff] }
   0x2   :  { %v10_v2 = vadd.f32 %v9_v1, %v8_v0 }
   0x4   :  { %11 = vadd.xlane.f32.xlu0 %v10_v2 }
  0x77   :  { %v12_v3 = vpop.xlane.xlu0 %11 }
  0x78   :  { %v13_v4 = vmul.f32 0.00390625, %v12_v3 }
  0x7a   :  { %15 = vst.msk [vmem:[%s40_s1] sm:$0xff] %vm14_vm0, %v13_v4 }

</bundles_post_ra>
